<compile_context>
chip_gen: v7x
topology: tpu7x:2x2x1
jax: 0.10.0
libtpu: 0.0.40
codegen_flags: <defaults>
</compile_context>

<pallas_src>
import functools

import jax
import jax.numpy as jnp
from jax.experimental import pallas as pl
from jax.experimental.pallas import tpu as pltpu

# ---- module hyper-parameters (chosen so the residual add is shape-legal) ----
N_CHANNEL = 4
KERNEL_SIZE = 3
STRIDE = 1
PADDING = 1          # stride=1, pad=(K-1)//2 keeps L fixed -> residual works


def skip_kernel(x_ref, p_ref, o_ref, *, C, K, L, pad):
    """One batch element per grid step.

    x_ref: (C, Lp)           activations for this batch element (zero-padded beyond L)
    p_ref: (2C, K*C + 1)     packed params: rows [0:C] = [W1 | b1], rows [C:2C] = [W2 | b2]
                             with W[:, k*C + ci] = conv_weight[co, ci, k]
    o_ref: (C, Lp)           output
    """
    Lp = o_ref.shape[-1]
    KC = K * C

    x = x_ref[...]                                   # (C, Lp) f32
    w1 = p_ref[0:C, 0:KC]                            # (C, K*C)
    b1 = p_ref[0:C, KC:KC + 1]                       # (C, 1)
    w2 = p_ref[C:2 * C, 0:KC]
    b2 = p_ref[C:2 * C, KC:KC + 1]

    def taps(v):
        # Stack K lane-shifted copies of v along the channel axis: row block k at column j
        # equals v[:, j + k - pad], with zero fill outside [0, Lp).  The zero fill (plus the
        # wrapper's zero lane-padding) IS the Conv1d "same" zero padding.
        pieces = []
        for k in range(K):
            d = k - pad
            if d == 0:
                pieces.append(v)
            elif d > 0:
                pieces.append(jnp.concatenate(
                    [v[:, d:], jnp.zeros((C, d), v.dtype)], axis=1))
            else:
                pieces.append(jnp.concatenate(
                    [jnp.zeros((C, -d), v.dtype), v[:, :d]], axis=1))
        return jnp.concatenate(pieces, axis=0)       # (K*C, Lp)

    # conv1 + bias + ReLU  (one MXU dot)
    a1 = jnp.maximum(
        jnp.dot(w1, taps(x), preferred_element_type=jnp.float32) + b1, 0.0)

    if L < Lp:
        # Columns >= L of a1 are garbage produced from the lane padding; conv2's right-edge
        # tap reads column L, which Conv1d semantics require to be zero.
        lane = jax.lax.broadcasted_iota(jnp.int32, (1, Lp), 1)
        a1 = jnp.where(lane < L, a1, 0.0)

    # conv2 (one MXU dot), then residual + conv2 bias + final ReLU in one VPU pass
    y2 = jnp.dot(w2, taps(a1), preferred_element_type=jnp.float32)
    o_ref[...] = jnp.maximum(x + y2 + b2, 0.0).astype(o_ref.dtype)


def skip_connection_forward(x, w1, b1, w2, b2, *, padding=PADDING):
    """x: (N, C, L) float32; weights: (C, C, K) (PyTorch Conv1d layout); biases: (C,)."""
    N, C, L = x.shape
    K = w1.shape[2]

    # lane-dense: pad L up to a multiple of 128 (no-op if it already is)
    Lp = max(128, ((L + 127) // 128) * 128)
    xp = x if Lp == L else jnp.pad(x, ((0, 0), (0, 0), (0, Lp - L)))

    # pack all conv params into one tiny 2-D tile: rows [0:C]=[W1|b1], rows [C:2C]=[W2|b2]
    w1s = jnp.transpose(w1, (0, 2, 1)).reshape(C, K * C)    # (C_out, K*C_in)
    w2s = jnp.transpose(w2, (0, 2, 1)).reshape(C, K * C)
    params = jnp.concatenate(
        [jnp.concatenate([w1s, b1.reshape(C, 1)], axis=1),
         jnp.concatenate([w2s, b2.reshape(C, 1)], axis=1)], axis=0)   # (2C, K*C+1)

    out = pl.pallas_call(
        functools.partial(skip_kernel, C=C, K=K, L=L, pad=padding),
        out_shape=jax.ShapeDtypeStruct((N, C, Lp), x.dtype),
        grid=(N,),                                            # one batch element per step
        in_specs=[
            pl.BlockSpec((None, C, Lp), lambda n: (n, 0, 0)),     # x block (batch squeezed)
            pl.BlockSpec((2 * C, K * C + 1), lambda n: (0, 0)),   # packed params (resident)
        ],
        out_specs=pl.BlockSpec((None, C, Lp), lambda n: (n, 0, 0)),
        compiler_params=pltpu.CompilerParams(
            dimension_semantics=("parallel",)),
    )(xp, params)

    return out if Lp == L else out[..., :L]


def _reference(x, w1, b1, w2, b2, padding=PADDING):
    """Pure-JAX reference (mirrors PyTorch Conv1d semantics)."""
    dn = ('NCH', 'OIH', 'NCH')

    def conv(inp, w, b):
        y = jax.lax.conv_general_dilated(
            inp, w, window_strides=(STRIDE,), padding=[(padding, padding)],
            dimension_numbers=dn)
        return y + b[None, :, None]

    r = jnp.maximum(conv(x, w1, b1), 0.0)
    r = conv(r, w2, b2)
    return jnp.maximum(x + r, 0.0)


if __name__ == "__main__":
    key = jax.random.PRNGKey(0)
    k_x, k_w1, k_b1, k_w2, k_b2 = jax.random.split(key, 5)

    N, C, L = 2, N_CHANNEL, 16
    x = jax.random.normal(k_x, (N, C, L), dtype=jnp.float32)
    # deterministic parameter init (Conv1d shapes: weight (C, C, K), bias (C,))
    w1 = 0.2 * jax.random.normal(k_w1, (C, C, KERNEL_SIZE), dtype=jnp.float32)
    b1 = 0.1 * jax.random.normal(k_b1, (C,), dtype=jnp.float32)
    w2 = 0.2 * jax.random.normal(k_w2, (C, C, KERNEL_SIZE), dtype=jnp.float32)
    b2 = 0.1 * jax.random.normal(k_b2, (C,), dtype=jnp.float32)

    out = jax.block_until_ready(skip_connection_forward(x, w1, b1, w2, b2))

    ref = _reference(x, w1, b1, w2, b2)
    assert out.shape == (N, C, L)
    assert jnp.allclose(out, ref, atol=1e-5, rtol=1e-5), "mismatch vs JAX reference"
    print("KERNEL_OK")
</pallas_src>

<mosaic_0001>
module attributes {stable_mosaic.version = 11 : i64} {
  func.func @skip_kernel(%arg0: i32, %arg1: memref<1x4x128xf32, #tpu.memory_space<vmem>>, %arg2: memref<8x13xf32, #tpu.memory_space<vmem>>, %arg3: memref<1x4x128xf32, #tpu.memory_space<vmem>>) attributes {dimension_semantics = [#tpu.dimension_semantics<parallel>], iteration_bounds = array<i64: 2>, scalar_prefetch = 0 : i64, scratch_operands = 0 : i64, tpu.core_type = #tpu.core_type<tc>, window_params = [{transform_indices = @transform_0, window_bounds = array<i64: 1, 4, 128>}, {pipeline_mode = #tpu.pipeline_mode<synchronous>, transform_indices = @transform_1, window_bounds = array<i64: 8, 13>}, {transform_indices = @transform_2, window_bounds = array<i64: 1, 4, 128>}]} {
    %c0 = arith.constant 0 : index
    %c0_0 = arith.constant 0 : index
    %c0_1 = arith.constant 0 : index
    %0 = vector.load %arg1[%c0, %c0_0, %c0_1] : memref<1x4x128xf32, #tpu.memory_space<vmem>>, vector<1x4x128xf32>
    %1 = vector.shape_cast %0 : vector<1x4x128xf32> to vector<4x128xf32>
    %c0_2 = arith.constant 0 : index
    %c0_3 = arith.constant 0 : index
    %2 = vector.load %arg2[%c0_2, %c0_3] : memref<8x13xf32, #tpu.memory_space<vmem>>, vector<4x12xf32>
    %c0_4 = arith.constant 0 : index
    %c12 = arith.constant 12 : index
    %3 = vector.load %arg2[%c0_4, %c12] : memref<8x13xf32, #tpu.memory_space<vmem>>, vector<4x1xf32>
    %c4 = arith.constant 4 : index
    %c0_5 = arith.constant 0 : index
    %4 = vector.load %arg2[%c4, %c0_5] : memref<8x13xf32, #tpu.memory_space<vmem>>, vector<4x12xf32>
    %c4_6 = arith.constant 4 : index
    %c12_7 = arith.constant 12 : index
    %5 = vector.load %arg2[%c4_6, %c12_7] : memref<8x13xf32, #tpu.memory_space<vmem>>, vector<4x1xf32>
    %cst = arith.constant 0.000000e+00 : f32
    %6 = vector.broadcast %cst : f32 to vector<4x1xf32>
    %7 = vector.extract_strided_slice %1 {offsets = [0, 0], sizes = [4, 127], strides = [1, 1]} : vector<4x128xf32> to vector<4x127xf32>
    %8 = tpu.concatenate %6, %7 in 1 : vector<4x1xf32>, vector<4x127xf32> -> vector<4x128xf32>
    %9 = vector.extract_strided_slice %1 {offsets = [0, 1], sizes = [4, 127], strides = [1, 1]} : vector<4x128xf32> to vector<4x127xf32>
    %cst_8 = arith.constant 0.000000e+00 : f32
    %10 = vector.broadcast %cst_8 : f32 to vector<4x1xf32>
    %11 = tpu.concatenate %9, %10 in 1 : vector<4x127xf32>, vector<4x1xf32> -> vector<4x128xf32>
    %12 = tpu.concatenate %8, %1, %11 in 0 : vector<4x128xf32>, vector<4x128xf32>, vector<4x128xf32> -> vector<12x128xf32>
    %cst_9 = arith.constant dense<0.000000e+00> : vector<4x128xf32>
    %13 = tpu.matmul %2, %12, %cst_9 {dimension_numbers = #tpu.dot_dimension_numbers<[1], [0], [0], [1], [0, 0, 1, 1], [], []>} : vector<4x12xf32>, vector<12x128xf32>, vector<4x128xf32> -> vector<4x128xf32>
    %14 = vector.broadcast %3 : vector<4x1xf32> to vector<4x128xf32>
    %15 = arith.addf %13, %14 : vector<4x128xf32>
    %cst_10 = arith.constant 0.000000e+00 : f32
    %16 = vector.broadcast %cst_10 : f32 to vector<4x128xf32>
    %17 = arith.maximumf %15, %16 : vector<4x128xf32>
    %18 = tpu.iota {dimensions = array<i32: 1>} : vector<1x128xi32>
    %c16_i32 = arith.constant 16 : i32
    %19 = vector.broadcast %c16_i32 : i32 to vector<1x128xi32>
    %20 = arith.cmpi slt, %18, %19 : vector<1x128xi32>
    %cst_11 = arith.constant 0.000000e+00 : f32
    %21 = vector.shape_cast %20 : vector<1x128xi1> to vector<1x128xi1>
    %22 = vector.broadcast %21 : vector<1x128xi1> to vector<4x128xi1>
    %23 = vector.broadcast %cst_11 : f32 to vector<4x128xf32>
    %24 = arith.select %22, %17, %23 : vector<4x128xi1>, vector<4x128xf32>
    %cst_12 = arith.constant 0.000000e+00 : f32
    %25 = vector.broadcast %cst_12 : f32 to vector<4x1xf32>
    %26 = vector.extract_strided_slice %24 {offsets = [0, 0], sizes = [4, 127], strides = [1, 1]} : vector<4x128xf32> to vector<4x127xf32>
    %27 = tpu.concatenate %25, %26 in 1 : vector<4x1xf32>, vector<4x127xf32> -> vector<4x128xf32>
    %28 = vector.extract_strided_slice %24 {offsets = [0, 1], sizes = [4, 127], strides = [1, 1]} : vector<4x128xf32> to vector<4x127xf32>
    %cst_13 = arith.constant 0.000000e+00 : f32
    %29 = vector.broadcast %cst_13 : f32 to vector<4x1xf32>
    %30 = tpu.concatenate %28, %29 in 1 : vector<4x127xf32>, vector<4x1xf32> -> vector<4x128xf32>
    %31 = tpu.concatenate %27, %24, %30 in 0 : vector<4x128xf32>, vector<4x128xf32>, vector<4x128xf32> -> vector<12x128xf32>
    %cst_14 = arith.constant dense<0.000000e+00> : vector<4x128xf32>
    %32 = tpu.matmul %4, %31, %cst_14 {dimension_numbers = #tpu.dot_dimension_numbers<[1], [0], [0], [1], [0, 0, 1, 1], [], []>} : vector<4x12xf32>, vector<12x128xf32>, vector<4x128xf32> -> vector<4x128xf32>
    %33 = arith.addf %1, %32 : vector<4x128xf32>
    %34 = vector.broadcast %5 : vector<4x1xf32> to vector<4x128xf32>
    %35 = arith.addf %33, %34 : vector<4x128xf32>
    %cst_15 = arith.constant 0.000000e+00 : f32
    %36 = vector.broadcast %cst_15 : f32 to vector<4x128xf32>
    %37 = arith.maximumf %35, %36 : vector<4x128xf32>
    %c0_16 = arith.constant 0 : index
    %c0_17 = arith.constant 0 : index
    %c0_18 = arith.constant 0 : index
    %38 = vector.load %arg3[%c0_16, %c0_17, %c0_18] : memref<1x4x128xf32, #tpu.memory_space<vmem>>, vector<1x4x128xf32>
    %39 = vector.shape_cast %38 : vector<1x4x128xf32> to vector<4x128xf32>
    %40 = vector.shape_cast %37 : vector<4x128xf32> to vector<1x4x128xf32>
    tpu.vector_store %arg3[%c0_16, %c0_17, %c0_18], %40 {strides = array<i32>} : memref<1x4x128xf32, #tpu.memory_space<vmem>>, vector<1x4x128xf32>,
    return
  }
  func.func @transform_0(%arg0: i32) -> (i32, i32, i32) {
    %c0_i32 = arith.constant 0 : i32
    %c0_i32_0 = arith.constant 0 : i32
    %c0_i32_1 = arith.constant 0 : i32
    return %arg0, %c0_i32, %c0_i32_0 : i32, i32, i32
  }
  func.func @transform_1(%arg0: i32) -> (i32, i32) {
    %c0_i32 = arith.constant 0 : i32
    %c0_i32_0 = arith.constant 0 : i32
    %c0_i32_1 = arith.constant 0 : i32
    return %c0_i32, %c0_i32_0 : i32, i32
  }
  func.func @transform_2(%arg0: i32) -> (i32, i32, i32) {
    %c0_i32 = arith.constant 0 : i32
    %c0_i32_0 = arith.constant 0 : i32
    %c0_i32_1 = arith.constant 0 : i32
    return %arg0, %c0_i32, %c0_i32_0 : i32, i32, i32
  }
}

</mosaic_0001>

<bundles_post_ra>
// kernel: tpu_custom_call.1
= control target key start
LH: loop header
LB: loop body
LE: loop exit
PB: predicated region body
PF: predicated region fallthrough
CT: control target
= control target key end

     0   :  { %7 = vsyncpa [#allocation3], 0  ;;  %s959_s0 = inlined_call_operand.hbm [shape: f32[2,4,128], index: 0, kind: input, shape index: {}]   ;;  %s960_s1 = inlined_call_operand.hbm [shape: f32[8,13], index: 1, kind: input, shape index: {}]   ;;  %s961_s2 = inlined_call_operand.hbm [shape: f32[2,4,128], index: 2, kind: output, shape index: {}]  }
   0x1   :  { %9 = vsyncpa [#allocation3 + $0x1], 0 }
   0x2   :  { %10 = vsyncpa [#allocation6], 0 }
   0x3   :  { %11 = vsyncpa [#allocation4], 0 }
   0x4   :  { %13 = vsyncpa [#allocation4 + $0x1], 0  ;;  %s735_s9 = smov 0   ;;  %s737_s10 = smov 0  }
   0x5   :  { %s739_s11 = smov 0   ;;  %s741_s12 = smov 0  }
   0x6 LB: > { %s756_s13 = sadd.s32 4294967295, %s708_s12   ;;  %s468_s14 = sadd.s32 4294967294, %s708_s12   ;;  %s708_s12 = sphi %s741_s12, %s987_s12   ;;  %s704_s11 = sphi %s739_s11, %s986_s11   ;;  %s700_s10 = sphi %s737_s10, %s985_s10   ;;  %s696_s9 = sphi %s735_s9, %s984_s9  }
   0x7   : > { %p39_p0 = scmp.ne.s32.totalorder %s700_s10, %s696_s9  ;;  %p962_p1 = scmp.eq.s32.totalorder %s756_s13, 0 }
   0x8   : > { %p90_p3 = scmp.eq.s32.totalorder %s468_s14, 1  ;;  %p469_p5 = scmp.ge.s32.totalorder %s708_s12, 1 }
   0x9   : > { %p765_p4 = por %p962_p1, %p39_p0  ;;  %p97_p7 = scmp.lt.s32.totalorder %s708_s12, 3 }
   0xa   : > { %p770_p6 = por %p90_p3, %p39_p0  ;;  %s710_s18 = smov [#allocation5]  }
   0xb   : > { %s965_s15 = scalar_select %p765_p4, 1, 0 }
   0xc   : > { %s966_s16 = scalar_select %p770_p6, 1, 0 }
   0xd   : > { %p775_p8 = pnand %p469_p5, %p97_p7  ;;  %s110_s19 = sshll.u32 %s710_s18, 4  ;;  %s111_s19 = int_to_ptr.vmem [resolvable:$true] %s110_s19 }
   0xe   : > { %s783_s20 = sadd.s32 1, %s708_s12   ;;  %s26_s24 = sadd.s32 1, %s704_s11 }
   0xf   : > { %s967_s17 = scalar_select %p775_p8, 1, 0 }
  0x10   : > { %p522_p10 = pneg %p775_p8  ;;  %s23_s22 = ssub.s32 %s708_s12, %s783_s20 }
  0x11   : > { %p793_p12 = scmp.eq.s32.totalorder %s23_s22, 0  ;;  %s580_s27 = scalar_lea.hbm %s960_s1, 128 }
  0x12   : > { %p787_p11 = pnand %p522_p10, %p962_p1  ;;  %p581_p0 = scmp.ne.s32.totalorder %s960_s1, %s580_s27 }
  0x13   : > { %s969_s23 = scalar_select %p793_p12, 1, 0 }
  0x14   : > { %p582_p3 = pneg %p787_p11  ;;  %p587_p10 = scmp.lt.u32.totalorder %s580_s27, %s960_s1 }
  0x16   : > { %p583_p5 = pnand %p582_p3, %p581_p0 }
  0x18   : > { %p584_p7 = pneg %p583_p5 }
  0x1a   : > { %p589_p9 = pnand %p587_p10, %p584_p7 }
  0x1c   : > { %592 = shalt.err (!%p589_p9)
}
  0x1d   : > { %s593_s4 = scalar_lea.vmem %s111_s19, 128  ;;  %p601_p6 = scmp.lt.s32.totalorder %s111_s19, %s111_s19 }
  0x1e   : > { %p594_p1 = scmp.ne.s32.totalorder %s111_s19, %s593_s4  ;;  %p602_p4 = scmp.lt.s32.totalorder %s593_s4, %s593_s4 }
  0x20   : > { %p596_p2 = pnand %p594_p1, %p582_p3  ;;  %p603_p8 = por %p602_p4, %p601_p6 }
  0x22   : > { %p597_p13 = pneg %p596_p2 }
  0x24   : > { %p604_p12 = pnand %p603_p8, %p597_p13 }
  0x26   : > { %607 = shalt.err (!%p604_p12)
}
  0x27   : > { %525 = dma.hbm_to_vmem [thread:$0]  (!%p787_p11), %s960_s1, 128, %s111_s19, [#allocation6]  }
  0x28   : > { %p970_p1 = scmp.ne.s32.totalorder %s969_s23, 0  ;;  %p34_p2 = scmp.eq.s32.totalorder %s708_s12, 0 }
  0x29   : > { %p971_p4 = scmp.ne.s32.totalorder %s704_s11, %s700_s10  ;;  %p972_p6 = scmp.eq.s32.totalorder %s756_s13, 1 }
  0x2a   : > { %s819_s7 = scalar_select %p970_p1, %s704_s11, %s26_s24  }
  0x2b   : > { %p827_p8 = por %p972_p6, %p971_p4  ;;  %p535_p9 = scmp.lt.s32.totalorder %s708_s12, 2 }
  0x2c   : > { %s121_s14 = sand.u32 1, %s704_s11   ;;  %p974_p12 = pmov %p971_p4 }
  0x2d   : > { %s472_s18 = sshll.u32 %s121_s14, 2  ;;  %s473_s21 = sshll.u32 %s708_s12, 6 }
  0x2e   : > { %p35_p13 = por %p34_p2, %p974_p12  ;;  %s840_s19 = scalar_lea.hbm %s959_s0, %s473_s21 }
  0x2f   : > { %s125_s23 = scalar_lea.vmem [#allocation2], %s472_s18  ;;  %s122_s27 = scalar_lea.sflag [#allocation3], %s121_s14 }
  0x30   : > { %s132_s24 = sshll.u32 %s125_s23, 4  ;;  %p842_p11 = pnand %p535_p9, %p35_p13  ;;  %s846_s24 = int_to_ptr.vmem [resolvable:$true] %s132_s24 }
  0x31   : > { %s608_s28 = scalar_lea.hbm %s840_s19, 64  ;;  %s613_s3 = scalar_lea.hbm %s959_s0, 128 }
  0x32   : > { %p609_p0 = scmp.ne.s32.totalorder %s840_s19, %s608_s28  ;;  %p610_p3 = pneg %p842_p11 }
  0x33   : > { %p614_p10 = scmp.lt.u32.totalorder %s840_s19, %s959_s0  ;;  %p615_p1 = scmp.lt.u32.totalorder %s613_s3, %s608_s28 }
  0x34   : > { %p611_p5 = pnand %p610_p3, %p609_p0  ;;  %p617_p4 = scmp.lt.u32.totalorder %s608_s28, %s840_s19 }
  0x35   : > { %p616_p2 = por %p615_p1, %p614_p10 }
  0x36   : > { %p612_p7 = pneg %p611_p5 }
  0x37   : > { %p618_p6 = por %p617_p4, %p616_p2 }
  0x39   : > { %p619_p9 = pnand %p618_p6, %p612_p7 }
  0x3b   : > { %622 = shalt.err (!%p619_p9)
}
  0x3c   : > { %s623_s6 = scalar_lea.vmem %s846_s24, 64  ;;  %s711_s14 = smov [#allocation2]  }
  0x3d   : > { %p624_p12 = scmp.ne.s32.totalorder %s846_s24, %s623_s6  ;;  %s628_s18 = sshll.u32 %s711_s14, 4  ;;  %s629_s18 = int_to_ptr.vmem [resolvable:$false] %s628_s18 }
  0x3e   : > { %s630_s21 = scalar_lea.vmem %s629_s18, 128  ;;  %p631_p5 = scmp.lt.s32.totalorder %s846_s24, %s629_s18 }
  0x3f   : > { %p626_p13 = pnand %p624_p12, %p610_p3  ;;  %p632_p10 = scmp.lt.s32.totalorder %s630_s21, %s623_s6 }
  0x41   : > { %p627_p0 = pneg %p626_p13  ;;  %p633_p1 = por %p632_p10, %p631_p5 }
  0x43   : > { %p634_p2 = pnand %p633_p1, %p627_p0 }
  0x45   : > { %637 = shalt.err (!%p634_p2)
}
  0x46   : > { %529 = dma.hbm_to_vmem [thread:$0]  (!%p842_p11), %s840_s19, 64, %s846_s24, %s122_s27  }
  0x47   : > { %p976_p7 = scmp.ne.s32.totalorder %s967_s17, 0 }
  0x48   : > { %s876_s22 = sand.u32 (!%p976_p7), 1, %s700_s10   ;;  %p977_p3 = scmp.ne.s32.totalorder (!%p976_p7), %s965_s15, 0 }
  0x49   : > { %141 = sbr.rel (%p976_p7) target bundleno = 784 (0x310), region = 28  ;;  %s475_s25 = sshll.u32 (!%p976_p7), %s876_s22, 2 }
  0x4a   : > { %s144_s23 = scalar_lea.sflag (!%p976_p7), [#allocation3], %s876_s22  ;;  %s147_s28 = scalar_lea.vmem (!%p976_p7), [#allocation2], %s475_s25 }
  0x50   : > { %683 = dma.done.wait (%p977_p3), %s144_s23, 64  }
  0x51   : > { %685 = vsyncadd (%p977_p3), %s144_s23, 4294967232  ;;  %p978_p11 = scmp.eq.s32.totalorder %s756_s13, 0 }
  0x53   : > { %687 = dma.done.wait (%p978_p11), [#allocation6], 128   ;;  %p979_p4 = pmov %p978_p11 }
  0x54   : > { %v712_v0 = vmov 0.0|0.0   ;;  %vm713_vm0 = vmmov 0   ;;  %v714_v1 = vmov 0.0   ;;  %v715_v2 = vmov 12   ;;  %v172_v3 = vld [vmem:[%s147_s28] sm:$0xf] }
  0x55   : > { %689 = vsyncadd (%p979_p4), [#allocation6], 4294967168  ;;  %506 = vmatprep.subr.bf16.mxu0 %v712_v0  ;;  %510 = vmatprep.subr.bf16.mxu1 %v712_v0  ;;  %v173_v4 = vld [vmem:[#allocation5] sm:$0xf]  ;;  %s716_s15 = smov 1   ;;  %s717_s17 = smov 127   ;;  %v272_v13 = vlaneseq }
  0x56   : > { %496 = vmatprep.mubr.msk.f32.mxu0 %vm713_vm0, %v714_v1  ;;  %503 = vmatprep.mubr.msk.f32.mxu1 %vm713_vm0, %v714_v1  ;;  %vm179_vm1 = vcmask 7168   ;;  %v186_v6 = vrot.slane %v172_v3, 4  ;;  %vm184_vm2 = vcmask 1039360   ;;  %vm188_vm3 = vcmask 1043456   ;;  %v174_v21 = vld [vmem:[#allocation5 + $0x4] sm:$0xf] }
  0x57   : > { %578 = vset.pattern.permute.xlu1 %v715_v2  ;;  %579 = vset.pattern.permute.xlu0 %v715_v2  ;;  %vm718_vm4 = vmmov 1   ;;  %vm195_vm6 = vcmask 97280   ;;  %v273_v15 = vand.u32 127, %v272_v13  ;;  %s483_s19 = sshll.u32 %s756_s13, 6  ;;  %s171_s24 = scalar_lea.vmem [#allocation7], %s475_s25 }
  0x58   : > { %176 = vrot.lane.b32.xlu0 %v172_v3, %s716_s15  ;;  %192 = vperm.xlu1 %578, %v173_v4   ;;  %vm895_vm5 = vmpackc.low %vm188_vm3, %vm718_vm4  ;;  %s388_s26 = sshll.u32 %s171_s24, 4  ;;  %s915_s30 = scalar_lea.hbm %s961_s2, %s483_s19  ;;  %s917_s26 = int_to_ptr.vmem [resolvable:$true] %s388_s26 }
  0x59   : > { %vm274_vm7 = vcmp.lt.s32.totalorder %v273_v15, 16  ;;  %s375_s3 = scalar_lea.sflag [#allocation4], %s876_s22  ;;  %s638_s4 = scalar_lea.vmem %s917_s26, 64 }
  0x5a   : > { %p639_p6 = scmp.ne.s32.totalorder %s917_s26, %s638_s4  ;;  %s719_s13 = smov [#allocation7]  }
  0x5b   : > { %s642_s5 = sshll.u32 %s719_s13, 4  ;;  %s643_s5 = int_to_ptr.vmem [resolvable:$false] %s642_s5 }
  0x5c   : > { %181 = vrot.lane.b32.xlu0 %v172_v3, %s717_s17  ;;  %p640_p9 = pnand %p639_p6, %p827_p8  ;;  %s644_s6 = scalar_lea.vmem %s643_s5, 128 }
  0x5d   : > { %p645_p13 = scmp.lt.s32.totalorder %s917_s26, %s643_s5  ;;  %p646_p0 = scmp.lt.s32.totalorder %s644_s6, %s638_s4 }
  0x5e   : > { %p641_p12 = pneg %p640_p9 }
  0x5f   : > { %p647_p5 = por %p646_p0, %p645_p13 }
  0x61   : > { %p648_p10 = pnand %p647_p5, %p641_p12 }
  0xca   : > { %v177_v5 = vpop.permute.xlu0 %176 }
  0xcb   : > { %v180_v7 = vsel %vm179_vm1, 0.0, %v177_v5 }
  0xcc   : > { %v189_v10 = vsel %vm188_vm3, %v180_v7, %v186_v6 }
  0xce   : > { %v182_v8 = vpop.permute.xlu0 %181 }
  0xcf   : > { %v185_v9 = vsel %vm184_vm2, %v182_v8, 0.0 }
  0xd0   : > { %v507_v12 = vpack.c.bf16 %v185_v9, %v189_v10 }
  0xd2   : > { %509 = vmatpush3.bf16.msk.msra.mxu0 %vm895_vm5, %v507_v12 }
  0xd5   : > { %497 = vmatmul.mubr.msk.f32.vlgmr.msra.gmra.mrb[0].mxu0 %vm195_vm6, %v173_v4 }
  0xd7   : > { %v193_v14 = vpop.permute.xlu1 %192 }
 0x1a8   : > { %v267_v16 = vpop.f32.mrb[0].mxu0 }
 0x1a9   : > { %v268_v17 = vadd.f32 %v267_v16, %v193_v14  ;;  %v498_v18 = vpop.f32.mrb[1].mxu0 }
 0x1ab   : > { %v271_v19 = vmax.f32 %v268_v17, 0.0 }
 0x1ad   : > { %v277_v20 = vsel %vm274_vm7, %v271_v19, 0.0 }
 0x1ae   : > { %283 = vrot.lane.b32.xlu0 %v277_v20, %s717_s17  ;;  %279 = vrot.lane.b32.xlu1 %v277_v20, %s716_s15  ;;  %v287_v22 = vrot.slane %v277_v20, 4 }
 0x1b2   : > { %368 = vperm.xlu1 %578, %v174_v21  }
 0x220   : > { %v284_v23 = vpop.permute.xlu0 %283  ;;  %v280_v24 = vpop.permute.xlu1 %279 }
 0x221   : > { %v286_v25 = vsel %vm184_vm2, %v284_v23, 0.0  ;;  %v282_v26 = vsel %vm179_vm1, 0.0, %v280_v24 }
 0x222   : > { %v289_v27 = vsel %vm188_vm3, %v282_v26, %v287_v22 }
 0x223   : > { %v511_v28 = vpack.c.bf16 %v286_v25, %v289_v27 }
 0x225   : > { %513 = vmatpush3.bf16.msk.msra.mxu1 %vm895_vm5, %v511_v28 }
 0x228   : > { %504 = vmatmul.mubr.msk.f32.vlgmr.msra.gmra.mrb[0].mxu1 %vm195_vm6, %v174_v21 }
 0x231   : > { %v369_v32 = vpop.permute.xlu1 %368 }
 0x2fb   : > { %v362_v29 = vpop.f32.mrb[0].mxu1 }
 0x2fc   : > { %v366_v30 = vadd.f32 %v362_v29, %v172_v3  ;;  %v505_v31 = vpop.f32.mrb[1].mxu1 }
 0x2fe   : > { %v371_v33 = vadd.f32 %v369_v32, %v366_v30 }
 0x300   : > { %v372_v34 = vmax.f32 %v371_v33, 0.0 }
 0x302   : > { %373 = vst [vmem:[%s171_s24] sm:$0xf] %v372_v34 }
 0x303   : > { %651 = shalt.err (!%p648_p10)
}
 0x304   : > { %s652_s14 = scalar_lea.hbm %s915_s30, 64  ;;  %s656_s22 = scalar_lea.hbm %s961_s2, 128 }
 0x305   : > { %p653_p1 = scmp.ne.s32.totalorder %s915_s30, %s652_s14  ;;  %p657_p3 = scmp.lt.u32.totalorder %s915_s30, %s961_s2 }
 0x306   : > { %p658_p11 = scmp.lt.u32.totalorder %s656_s22, %s652_s14  ;;  %p660_p6 = scmp.lt.u32.totalorder %s652_s14, %s915_s30 }
 0x307   : > { %p654_p2 = pnand %p653_p1, %p827_p8 }
 0x308   : > { %p659_p4 = por %p658_p11, %p657_p3 }
 0x309   : > { %p655_p7 = pneg %p654_p2 }
 0x30a   : > { %p661_p9 = por %p660_p6, %p659_p4 }
 0x30c   : > { %p662_p12 = pnand %p661_p9, %p655_p7 }
 0x30e   : > { %665 = shalt.err (!%p662_p12)
}
 0x30f   : > { %520 = dma.vmem_to_hbm [thread:$0]  (%p827_p8), %s917_s26, 64, %s915_s30, %s375_s3  }
 0x310 PF: > { %s400_s28 = sand.u32 1, %s696_s9   ;;  %p982_p13 = scmp.ne.s32.totalorder %s966_s16, 0 }
 0x311   : > { %p983_p0 = scmp.ge.s32.totalorder %s708_s12, 2  ;;  %s401_s15 = scalar_lea.sflag [#allocation4], %s400_s28 }
 0x313   : > { %p531_p5 = pnand %p983_p0, %p982_p13 }
 0x315   : > { %691 = dma.done.wait (!%p531_p5), %s401_s15, 64  }
 0x316   : > { %693 = vsyncadd (!%p531_p5), %s401_s15, 4294967232  ;;  %p16_p10 = scmp.ge.s32.totalorder %s783_s20, 4   ;;  %s984_s9 = smov %s700_s10 }
 0x317   : > { %s985_s10 = smov %s704_s11  ;;  %s986_s11 = smov %s819_s7 }
 0x318   : > { %s987_s12 = smov %s783_s20  ;;  %18 = sbr.rel (!%p16_p10) target bundleno = 6 (0x6), region = 77 }
 0x31f   :  { %406 = vsyncpa [#allocation3], 1 }
 0x320   :  { %408 = vsyncpa [#allocation3 + $0x1], 1 }
 0x321   :  { %409 = vsyncpa [#allocation6], 1 }
 0x322   :  { %410 = vsyncpa [#allocation4], 1 }
 0x323   :  { %412 = vsyncpa [#allocation4 + $0x1], 1 }

</bundles_post_ra>
